<compile_context>
chip_gen: v5e
topology: v5e:2x2
jax: 0.10.0
libtpu: 0.0.40
codegen_flags: <defaults>
</compile_context>

<pallas_src>
import math
import functools

import numpy as np
import jax
import jax.numpy as jnp
from jax.experimental import pallas as pl
from jax.experimental.pallas import tpu as pltpu

ALPHA = 0.001
BETA = 0.001
LOG_POP_SIZE_OFFSET = 10.0
LOG2PI = math.log(2.0 * math.pi)


# ---------------------------------------------------------------------------
# Pallas kernel: batch on the 128-lane axis, populations on the sublane axis.
def _skyride_kernel(lps_ref, wcoal_ref, wcf_ref, g_ref, out_ref, *,
                    alpha, beta, n_pop):
    lps = lps_ref[...]                              # (P_pad, TB) f32 log eff pop sizes
    w_coal = wcoal_ref[...].astype(jnp.float32)     # (P_pad, TB) per-pop coalescent counts
    w_cf = wcf_ref[...].astype(jnp.float32)         # (P_pad, TB) per-pop sum(intervals*cf)
    g = g_ref[...]                                  # (1, TB)     raw Gamma(0.5*P + alpha) draw

    # --- loglikelihood_batch (event axis pre-aggregated per population) ------
    # Padding rows contribute exactly 0 because w_coal == w_cf == 0 there and
    # lps padding is 0 (exp(-0) finite).
    inv = jnp.exp(-lps)                                            # EUP: B*P, not B*E
    loglik = (-jnp.sum(lps * w_coal, axis=0, keepdims=True)
              - jnp.sum(inv * w_cf, axis=0, keepdims=True))        # (1, TB)

    # --- GMRF squared increments over the *real* populations only ------------
    if n_pop > 1:
        d = lps[1:n_pop, :] - lps[:n_pop - 1, :]                   # (P-1, TB) sublane shift
        ssq = jnp.sum(d * d, axis=0, keepdims=True)                # (1, TB)
    else:
        ssq = jnp.zeros_like(g)

    half = 0.5 * (n_pop - 1)
    const = alpha * math.log(beta) - math.lgamma(alpha)            # trace-time scalar

    # --- logprior_marginal_batch ----------------------------------------------
    logprior_marg = (-half * LOG2PI + const + math.lgamma(half + alpha)
                     - (half + alpha) * jnp.log(beta + 0.5 * ssq))

    # --- sample_precision tail + logprior_batch (monitor_precision branch) ----
    rate = 0.5 * ssq + beta
    tau = g / rate                                                 # (1, TB)
    log_tau = jnp.log(tau)
    # sum over (P-1) of (-0.5*log2pi + 0.5*log_tau) collapses: log_tau per tree.
    term1 = (n_pop - 1) * (-0.5 * LOG2PI + 0.5 * log_tau) - 0.5 * tau * ssq
    term2 = const + (alpha - 1.0) * log_tau - beta * tau

    # Single lane-dense full-block store: row 0 = marginal path, row 1 = sampled-tau.
    row = jax.lax.broadcasted_iota(jnp.int32, (2, loglik.shape[1]), 0)
    out_ref[...] = jnp.where(row == 0,
                             loglik + logprior_marg,
                             loglik + term1 + term2)


# ---------------------------------------------------------------------------
# Tiling helpers.
def _vmem_budget_bytes():
    """Per-kernel VMEM budget: ~cap/4 (≈16 MiB on v7x, 32 MiB on v5e/v6e)."""
    cap = 64 << 20
    try:
        info = pltpu.get_tpu_info()
        cap = int(getattr(info, "vmem_capacity_bytes", cap) or cap)
    except Exception:
        pass
    return int(min(cap // 4, 32 << 20))


def _choose_batch_tile(b128, p_pad, budget_bytes):
    """Largest 128-multiple lane tile under the VMEM budget, keeping >=2 grid steps
    (dual-TC split on v7x, pipeline overlap) whenever the batch allows it."""
    # double-buffered f32 bytes per batch column: 3 (P_pad)-row inputs + gamma + out.
    bytes_per_col = (3 * p_pad + 1 + 2) * 4 * 2
    tb = (budget_bytes // bytes_per_col) // 128 * 128
    tb = max(128, min(tb, b128))
    if b128 >= 256:
        half = ((b128 // 2) + 127) // 128 * 128
        tb = min(tb, half)
    return tb


def skyride_forward(log_pop_size, w_coal, w_cf, gamma_draw, *,
                    alpha=ALPHA, beta=BETA, batch_tile=None):
    """Returns (loglik + marginal GMRF prior, loglik + sampled-tau GMRF prior)."""
    if not isinstance(alpha, (int, float)) or not isinstance(beta, (int, float)):
        # alpha/beta are baked as compile-time constants.
        raise TypeError("alpha/beta must be Python numbers (compile-time constants)")

    B, P = log_pop_size.shape
    P_pad = max(8, ((P + 7) // 8) * 8)            # sublane-aligned population axis
    B128 = ((B + 127) // 128) * 128               # lane-aligned batch axis

    if batch_tile is None:
        TB = _choose_batch_tile(B128, P_pad, _vmem_budget_bytes())
    else:
        if batch_tile % 128 != 0:
            raise ValueError("batch_tile must be a multiple of 128 (lane width)")
        TB = int(batch_tile)

    grid_n = pl.cdiv(B128, TB)
    B_pad = grid_n * TB

    # Transpose to (pop, batch) and pad with safe values so padded lanes/rows stay
    # finite (lps=0 -> exp(0)=1 times weight 0; gamma=1 -> finite log(tau)).
    def prep(x, rows):
        xt = jnp.swapaxes(jnp.asarray(x, jnp.float32), 0, 1)      # (rows_in, B)
        return jnp.pad(xt, ((0, rows - xt.shape[0]), (0, B_pad - B)))

    lps_t = prep(log_pop_size, P_pad)
    wcoal_t = prep(w_coal, P_pad)
    wcf_t = prep(w_cf, P_pad)
    g_t = jnp.pad(jnp.asarray(gamma_draw, jnp.float32).reshape(1, B),
                  ((0, 0), (0, B_pad - B)), constant_values=1.0)

    kern = functools.partial(_skyride_kernel, alpha=float(alpha),
                             beta=float(beta), n_pop=P)

    vmem_bytes = (3 * P_pad + 1 + 2) * 4 * 2 * TB
    cp_kwargs = dict(dimension_semantics=("parallel",))            # dual-TC split on v7x
    if vmem_bytes > (12 << 20):
        cp_kwargs["vmem_limit_bytes"] = int(min(vmem_bytes + (4 << 20), 48 << 20))

    out = pl.pallas_call(
        kern,
        grid=(grid_n,),
        in_specs=[pl.BlockSpec((P_pad, TB), lambda i: (0, i)),
                  pl.BlockSpec((P_pad, TB), lambda i: (0, i)),
                  pl.BlockSpec((P_pad, TB), lambda i: (0, i)),
                  pl.BlockSpec((1, TB), lambda i: (0, i))],
        out_specs=pl.BlockSpec((2, TB), lambda i: (0, i)),
        out_shape=jax.ShapeDtypeStruct((2, B_pad), jnp.float32),
        compiler_params=pltpu.CompilerParams(**cp_kwargs),
    )(lps_t, wcoal_t, wcf_t, g_t)
    return out[0, :B], out[1, :B]


# ---------------------------------------------------------------------------
# Glue: per-tree aggregation (the only place the (B, E) event axis is touched).
# Segment-sum via one-hot batched matmul (MXU-friendly) — replaces the vmapped
# scatter-add, which XLA lowers to slow serialized updates on TPU.
def aggregate_per_population(pop_size_mask, coal_mask, intervals, cf, n_pop):
    onehot = (pop_size_mask[..., None]
              == jnp.arange(n_pop, dtype=pop_size_mask.dtype)).astype(jnp.float32)
    w_coal = jnp.einsum('be,bep->bp', coal_mask.astype(jnp.float32), onehot,
                        precision=jax.lax.Precision.HIGHEST)
    w_cf = jnp.einsum('be,bep->bp', (intervals * cf).astype(jnp.float32), onehot,
                      precision=jax.lax.Precision.HIGHEST)
    return w_coal, w_cf


# ---------------------------------------------------------------------------
# Plain-JAX reference (mirrors the PyTorch math, un-aggregated) for sanity check.
def reference_forward(lps, mask, coal, intv, cf, g, alpha=ALPHA, beta=BETA):
    log_eff = jnp.take_along_axis(lps, mask, axis=-1)
    loglik = (jnp.sum(-log_eff * coal, -1)
              - jnp.sum(jnp.exp(-log_eff) * intv * cf, -1))
    diff = lps[:, 1:] - lps[:, :-1]
    ssq = jnp.sum(diff ** 2, -1)
    P = lps.shape[1]
    half = 0.5 * (P - 1)
    marg = (-half * LOG2PI + alpha * math.log(beta) - math.lgamma(alpha)
            + math.lgamma(half + alpha) - (half + alpha) * jnp.log(beta + 0.5 * ssq))
    tau = g[:, 0] / (0.5 * ssq + beta)
    log_tau = jnp.log(tau)
    t1 = jnp.sum(-0.5 * LOG2PI + 0.5 * log_tau[:, None]
                 - 0.5 * tau[:, None] * diff ** 2, -1)
    t2 = (alpha * math.log(beta) - math.lgamma(alpha)
          + (alpha - 1.0) * log_tau - beta * tau)
    return loglik + marg, loglik + t1 + t2


# ---------------------------------------------------------------------------
# Glue: replicate update_batch / get_batch_coalescent_info for a synthetic
# serially-sampled coalescent with contemporaneous tips (grid=False path).
def build_coalescent_state(ntips, B, key):
    P = ntips - 1
    coal_times = np.sort(np.asarray(
        jax.random.uniform(key, (B, P), minval=0.1, maxval=5.0)), axis=-1)
    heights = np.concatenate(
        [np.zeros((B, ntips), np.float32), coal_times.astype(np.float32)], axis=-1)
    event_info = np.concatenate(
        [-np.ones((B, ntips), np.float32), np.ones((B, P), np.float32)], axis=-1)

    order = np.argsort(-heights, axis=-1, kind="stable")     # descending sort
    event_time = np.take_along_axis(heights, order, axis=-1)
    ev = np.take_along_axis(event_info, order, axis=-1)[:, :-1]
    intervals = event_time[:, :-1] - event_time[:, 1:]
    lineages = 1.0 + np.cumsum(ev, axis=-1)
    cf = lineages * (lineages - 1.0) / 2.0
    coal_mask = (ev == 1).astype(np.float32)

    E = ev.shape[1]
    coal_pos = np.stack([np.nonzero(ev[b] == 1)[0] for b in range(B)])
    event_count = np.concatenate([coal_pos, np.full((B, 1), E, np.int64)], -1)
    event_range = event_count[:, 1:] - event_count[:, :-1]
    pop_size_mask = np.repeat(
        np.tile(np.arange(event_range.shape[1]), B),
        event_range.flatten()).reshape(B, -1).astype(np.int32)

    return (jnp.asarray(pop_size_mask),
            jnp.asarray(coal_mask, jnp.float32),
            jnp.asarray(intervals, jnp.float32),
            jnp.asarray(cf, jnp.float32))


if __name__ == "__main__":
    # B=200 pads to 256 lanes -> a 2-step "parallel" grid of 128-wide tiles,
    # exercising both the batch tiling and the lane-padding paths.
    ntips, B = 8, 200
    P = ntips - 1

    key = jax.random.PRNGKey(0)
    k_tree, k_eps, k_gamma = jax.random.split(key, 3)

    pop_size_mask, coal_mask, intervals, cf = build_coalescent_state(ntips, B, k_tree)
    # per-tree aggregation (replaces the in-kernel gather over the event axis)
    w_coal, w_cf = aggregate_per_population(pop_size_mask, coal_mask, intervals, cf, P)

    # pop_size_param is nn.Parameter(zeros(ntips-1, 2)) -> mean = offset, std = exp(0) = 1
    pop_size_param = jnp.zeros((P, 2), jnp.float32)
    mean = pop_size_param[:, 0] + LOG_POP_SIZE_OFFSET
    std = pop_size_param[:, 1]
    eps = jax.random.normal(k_eps, (B, P), jnp.float32)
    log_pop_size = mean + jnp.exp(std) * eps                      # (B, P)

    # TODO(synk): np.random.gamma draw is stochastic; the raw Gamma(shape) sample is
    # drawn in glue with jax.random.gamma and the rest of sample_precision is in-kernel.
    shape_value = 0.5 * P + ALPHA
    gamma_draw = jax.random.gamma(k_gamma, shape_value, (B, 1)).astype(jnp.float32)

    out_marg, out_gmrf = skyride_forward(log_pop_size, w_coal, w_cf, gamma_draw)
    jax.block_until_ready((out_marg, out_gmrf))

    ref_marg, ref_gmrf = reference_forward(
        log_pop_size, pop_size_mask, coal_mask, intervals, cf, gamma_draw)
    np.testing.assert_allclose(np.asarray(out_marg), np.asarray(ref_marg),
                               rtol=1e-4, atol=1e-3)
    np.testing.assert_allclose(np.asarray(out_gmrf), np.asarray(ref_gmrf),
                               rtol=1e-4, atol=1e-3)

    print("KERNEL_OK")
</pallas_src>

<mosaic_0001>
module attributes {stable_mosaic.version = 11 : i64} {
  func.func @_skyride_kernel(%arg0: i32, %arg1: memref<8x128xf32, #tpu.memory_space<vmem>>, %arg2: memref<8x128xf32, #tpu.memory_space<vmem>>, %arg3: memref<8x128xf32, #tpu.memory_space<vmem>>, %arg4: memref<1x128xf32, #tpu.memory_space<vmem>>, %arg5: memref<2x128xf32, #tpu.memory_space<vmem>>) attributes {dimension_semantics = [#tpu.dimension_semantics<parallel>], iteration_bounds = array<i64: 2>, scalar_prefetch = 0 : i64, scratch_operands = 0 : i64, tpu.core_type = #tpu.core_type<tc>, window_params = [{transform_indices = @transform_0, window_bounds = array<i64: 8, 128>}, {transform_indices = @transform_1, window_bounds = array<i64: 8, 128>}, {transform_indices = @transform_2, window_bounds = array<i64: 8, 128>}, {transform_indices = @transform_3, window_bounds = array<i64: 1, 128>}, {transform_indices = @transform_4, window_bounds = array<i64: 2, 128>}]} {
    %c0 = arith.constant 0 : index
    %c0_0 = arith.constant 0 : index
    %0 = vector.load %arg1[%c0, %c0_0] : memref<8x128xf32, #tpu.memory_space<vmem>>, vector<8x128xf32>
    %c0_1 = arith.constant 0 : index
    %c0_2 = arith.constant 0 : index
    %1 = vector.load %arg2[%c0_1, %c0_2] : memref<8x128xf32, #tpu.memory_space<vmem>>, vector<8x128xf32>
    %c0_3 = arith.constant 0 : index
    %c0_4 = arith.constant 0 : index
    %2 = vector.load %arg3[%c0_3, %c0_4] : memref<8x128xf32, #tpu.memory_space<vmem>>, vector<8x128xf32>
    %c0_5 = arith.constant 0 : index
    %c0_6 = arith.constant 0 : index
    %3 = vector.load %arg4[%c0_5, %c0_6] : memref<1x128xf32, #tpu.memory_space<vmem>>, vector<1x128xf32>
    %cst = arith.constant 0.000000e+00 : f32
    %4 = vector.broadcast %cst : f32 to vector<8x128xf32>
    %5 = arith.subf %4, %0 : vector<8x128xf32>
    %6 = math.exp %5 : vector<8x128xf32>
    %7 = arith.mulf %0, %1 : vector<8x128xf32>
    %cst_7 = arith.constant dense<0.000000e+00> : vector<128xf32>
    %8 = vector.multi_reduction <add>, %7, %cst_7 [0] : vector<8x128xf32> to vector<128xf32>
    %9 = vector.shape_cast %8 : vector<128xf32> to vector<1x128xf32>
    %cst_8 = arith.constant 0.000000e+00 : f32
    %10 = vector.broadcast %cst_8 : f32 to vector<1x128xf32>
    %11 = arith.subf %10, %9 : vector<1x128xf32>
    %12 = arith.mulf %6, %2 : vector<8x128xf32>
    %cst_9 = arith.constant dense<0.000000e+00> : vector<128xf32>
    %13 = vector.multi_reduction <add>, %12, %cst_9 [0] : vector<8x128xf32> to vector<128xf32>
    %14 = vector.shape_cast %13 : vector<128xf32> to vector<1x128xf32>
    %15 = arith.subf %11, %14 : vector<1x128xf32>
    %16 = vector.extract_strided_slice %0 {offsets = [1, 0], sizes = [6, 128], strides = [1, 1]} : vector<8x128xf32> to vector<6x128xf32>
    %17 = vector.extract_strided_slice %0 {offsets = [0, 0], sizes = [6, 128], strides = [1, 1]} : vector<8x128xf32> to vector<6x128xf32>
    %18 = arith.subf %16, %17 : vector<6x128xf32>
    %19 = arith.mulf %18, %18 : vector<6x128xf32>
    %cst_10 = arith.constant dense<0.000000e+00> : vector<128xf32>
    %20 = vector.multi_reduction <add>, %19, %cst_10 [0] : vector<6x128xf32> to vector<128xf32>
    %21 = vector.shape_cast %20 : vector<128xf32> to vector<1x128xf32>
    %cst_11 = arith.constant 5.000000e-01 : f32
    %22 = vector.broadcast %cst_11 : f32 to vector<1x128xf32>
    %23 = arith.mulf %22, %21 : vector<1x128xf32>
    %cst_12 = arith.constant 1.000000e-03 : f32
    %24 = vector.broadcast %cst_12 : f32 to vector<1x128xf32>
    %25 = arith.addf %24, %23 : vector<1x128xf32>
    %26 = math.log %25 : vector<1x128xf32>
    %cst_13 = arith.constant 3.001000e+00 : f32
    %27 = vector.broadcast %cst_13 : f32 to vector<1x128xf32>
    %28 = arith.mulf %27, %26 : vector<1x128xf32>
    %cst_14 = arith.constant -11.7336473 : f32
    %29 = vector.broadcast %cst_14 : f32 to vector<1x128xf32>
    %30 = arith.subf %29, %28 : vector<1x128xf32>
    %cst_15 = arith.constant 5.000000e-01 : f32
    %31 = vector.broadcast %cst_15 : f32 to vector<1x128xf32>
    %32 = arith.mulf %31, %21 : vector<1x128xf32>
    %cst_16 = arith.constant 1.000000e-03 : f32
    %33 = vector.broadcast %cst_16 : f32 to vector<1x128xf32>
    %34 = arith.addf %32, %33 : vector<1x128xf32>
    %35 = arith.divf %3, %34 : vector<1x128xf32>
    %36 = math.log %35 : vector<1x128xf32>
    %cst_17 = arith.constant 5.000000e-01 : f32
    %37 = vector.broadcast %cst_17 : f32 to vector<1x128xf32>
    %38 = arith.mulf %37, %36 : vector<1x128xf32>
    %cst_18 = arith.constant -0.918938517 : f32
    %39 = vector.broadcast %cst_18 : f32 to vector<1x128xf32>
    %40 = arith.addf %39, %38 : vector<1x128xf32>
    %cst_19 = arith.constant 6.000000e+00 : f32
    %41 = vector.broadcast %cst_19 : f32 to vector<1x128xf32>
    %42 = arith.mulf %41, %40 : vector<1x128xf32>
    %cst_20 = arith.constant 5.000000e-01 : f32
    %43 = vector.broadcast %cst_20 : f32 to vector<1x128xf32>
    %44 = arith.mulf %43, %35 : vector<1x128xf32>
    %45 = arith.mulf %44, %21 : vector<1x128xf32>
    %46 = arith.subf %42, %45 : vector<1x128xf32>
    %cst_21 = arith.constant -9.990000e-01 : f32
    %47 = vector.broadcast %cst_21 : f32 to vector<1x128xf32>
    %48 = arith.mulf %47, %36 : vector<1x128xf32>
    %cst_22 = arith.constant -6.91408682 : f32
    %49 = vector.broadcast %cst_22 : f32 to vector<1x128xf32>
    %50 = arith.addf %49, %48 : vector<1x128xf32>
    %cst_23 = arith.constant 1.000000e-03 : f32
    %51 = vector.broadcast %cst_23 : f32 to vector<1x128xf32>
    %52 = arith.mulf %51, %35 : vector<1x128xf32>
    %53 = arith.subf %50, %52 : vector<1x128xf32>
    %54 = tpu.iota {dimensions = array<i32: 0>} : vector<2x128xi32>
    %c0_i32 = arith.constant 0 : i32
    %55 = vector.broadcast %c0_i32 : i32 to vector<2x128xi32>
    %56 = arith.cmpi eq, %54, %55 : vector<2x128xi32>
    %57 = arith.addf %15, %30 : vector<1x128xf32>
    %58 = arith.addf %15, %46 : vector<1x128xf32>
    %59 = arith.addf %58, %53 : vector<1x128xf32>
    %60 = vector.shape_cast %57 : vector<1x128xf32> to vector<1x128xf32>
    %61 = vector.broadcast %60 : vector<1x128xf32> to vector<2x128xf32>
    %62 = vector.shape_cast %59 : vector<1x128xf32> to vector<1x128xf32>
    %63 = vector.broadcast %62 : vector<1x128xf32> to vector<2x128xf32>
    %64 = arith.select %56, %61, %63 : vector<2x128xi1>, vector<2x128xf32>
    %c0_24 = arith.constant 0 : index
    %c0_25 = arith.constant 0 : index
    %65 = vector.load %arg5[%c0_24, %c0_25] : memref<2x128xf32, #tpu.memory_space<vmem>>, vector<2x128xf32>
    tpu.vector_store %arg5[%c0_24, %c0_25], %64 {strides = array<i32>} : memref<2x128xf32, #tpu.memory_space<vmem>>, vector<2x128xf32>,
    return
  }
  func.func @transform_0(%arg0: i32) -> (i32, i32) {
    %c0_i32 = arith.constant 0 : i32
    %c0_i32_0 = arith.constant 0 : i32
    return %c0_i32, %arg0 : i32, i32
  }
  func.func @transform_1(%arg0: i32) -> (i32, i32) {
    %c0_i32 = arith.constant 0 : i32
    %c0_i32_0 = arith.constant 0 : i32
    return %c0_i32, %arg0 : i32, i32
  }
  func.func @transform_2(%arg0: i32) -> (i32, i32) {
    %c0_i32 = arith.constant 0 : i32
    %c0_i32_0 = arith.constant 0 : i32
    return %c0_i32, %arg0 : i32, i32
  }
  func.func @transform_3(%arg0: i32) -> (i32, i32) {
    %c0_i32 = arith.constant 0 : i32
    %c0_i32_0 = arith.constant 0 : i32
    return %c0_i32, %arg0 : i32, i32
  }
  func.func @transform_4(%arg0: i32) -> (i32, i32) {
    %c0_i32 = arith.constant 0 : i32
    %c0_i32_0 = arith.constant 0 : i32
    return %c0_i32, %arg0 : i32, i32
  }
}

</mosaic_0001>

<bundles_post_ra>
// kernel: tpu_custom_call.1
= control target key start
LH: loop header
LB: loop body
LE: loop exit
PB: predicated region body
PF: predicated region fallthrough
CT: control target
= control target key end

     0   :  { %s983_s0 = inlined_call_operand.hbm [shape: f32[8,256], index: 0, kind: input, shape index: {}]   ;;  %s984_s1 = inlined_call_operand.hbm [shape: f32[8,256], index: 1, kind: input, shape index: {}]   ;;  %s985_s2 = inlined_call_operand.hbm [shape: f32[8,256], index: 2, kind: input, shape index: {}]   ;;  %s986_s3 = inlined_call_operand.vmem [shape: f32[1,256], index: 3, kind: input, shape index: {}]   ;;  %s987_s4 = inlined_call_operand.hbm [shape: f32[2,256], index: 4, kind: output, shape index: {}]  }
   0x1   :  { %989 = sst [smem:[#allocation14_spill]] %s984_s1 }
   0x2   :  { %9 = vsyncpa [#allocation3], 0 }
   0x3   :  { %11 = vsyncpa [#allocation3 + $0x1], 0 }
   0x4   :  { %12 = vsyncpa [#allocation6], 0 }
   0x5   :  { %14 = vsyncpa [#allocation6 + $0x1], 0 }
   0x6   :  { %15 = vsyncpa [#allocation4], 0 }
   0x7   :  { %17 = vsyncpa [#allocation4 + $0x1], 0  ;;  %s792_s15 = smov 0   ;;  %s794_s16 = smov 0  }
   0x8   :  { %s796_s17 = smov 0   ;;  %s798_s18 = smov 0  }
   0x9 LB: > { %990 = sst [smem:[#allocation12_spill]] %s761_s17  ;;  %s813_s19 = sadd.s32 4294967295, %s765_s18   ;;  %s765_s18 = sphi %s798_s18, %s1002_s18   ;;  %s761_s17 = sphi %s796_s17, %s999_s17   ;;  %s757_s16 = sphi %s794_s16, %s1001_s16   ;;  %s753_s15 = sphi %s792_s15, %s1000_s15  }
   0xa   : > { %s523_s20 = sadd.s32 4294967294, %s765_s18   ;;  %s817_s21 = sadd.s32 1, %s765_s18  }
   0xb   : > { %s30_s22 = sadd.s32 1, %s761_s17  ;;  %s27_s23 = ssub.s32 %s765_s18, %s817_s21 }
   0xc   : > { %p37_p0 = scmp.ne.s32.totalorder %s761_s17, %s757_s16  ;;  %p28_p1 = scmp.eq.s32.totalorder %s27_s23, 0 }
   0xd   : > { %p38_p2 = scmp.eq.s32.totalorder %s765_s18, 0  ;;  %p43_p3 = scmp.ne.s32.totalorder %s757_s16, %s753_s15 }
   0xe   : > { %p44_p4 = scmp.eq.s32.totalorder %s813_s19, 0  ;;  %p145_p7 = scmp.eq.s32.totalorder %s813_s19, 1 }
   0xf   : > { %s829_s24 = scalar_select %p28_p1, %s761_s17, %s30_s22  }
  0x10   : > { %p39_p5 = por %p38_p2, %p37_p0  ;;  %p831_p6 = por %p44_p4, %p43_p3 }
  0x11   : > { %991 = sst [smem:[#allocation13_spill]] %s829_s24  ;;  %p151_p8 = scmp.eq.s32.totalorder %s523_s20, 1 }
  0x12   : > { %p525_p9 = scmp.ge.s32.totalorder %s765_s18, 2  ;;  %p563_p10 = scmp.lt.s32.totalorder %s765_s18, 2 }
  0x13   : > { %p838_p11 = por %p145_p7, %p37_p0  ;;  %p842_p12 = por %p151_p8, %p43_p3 }
  0x14   : > { %s171_s28 = sand.u32 1, %s761_s17   ;;  %s848_s29 = sshll.u32 %s765_s18, 3 }
  0x15   : > { %s852_s30 = sshll.u32 %s171_s28, 3  ;;  %p854_p13 = pnand %p563_p10, %p39_p5 }
  0x16   : > { %s190_s6 = sand.u32 1, %s765_s18   ;;  %s996_s1 = sld [smem:[#allocation14_spill]] }
  0x17   : > { %s194_s10 = scalar_lea.vmem [#allocation5], %s852_s30  ;;  %p532_p0 = scmp.ge.s32.totalorder %s765_s18, 1 }
  0x18   : > { %s202_s11 = sshll.u32 %s194_s10, 4  ;;  %s865_s13 = scalar_lea.sflag [#allocation6], %s190_s6  ;;  %s203_s11 = int_to_ptr.vmem [resolvable:$true] %s202_s11 }
  0x19   : > { %p609_p2 = pneg %p854_p13 }
  0x1c   : > { %s198_s9 = scalar_lea.hbm %s996_s1, %s848_s29  ;;  %s612_s7 = scalar_lea.hbm %s996_s1, 16 }
  0x1d   : > { %s200_s12 = sshll.u32 %s198_s9, 4  ;;  %s201_s12 = int_to_ptr.hbm [resolvable:$true] %s200_s12 }
  0x1e   : > { %s605_s14 = sshra.s32 %s201_s12, 4  ;;  %s606_s14 = int_to_ptr.hbm [resolvable:$true] %s605_s14 }
  0x1f   : > { %s607_s20 = scalar_lea.hbm %s606_s14, 8  ;;  %p613_p5 = scmp.lt.s32.totalorder %s606_s14, %s996_s1 }
  0x20   : > { %p608_p1 = scmp.ne.s32.totalorder %s606_s14, %s607_s20  ;;  %p614_p7 = scmp.lt.s32.totalorder %s612_s7, %s607_s20 }
  0x22   : > { %p610_p3 = pnand %p609_p2, %p608_p1  ;;  %p615_p8 = por %p614_p7, %p613_p5 }
  0x24   : > { %p611_p4 = pneg %p610_p3 }
  0x26   : > { %p616_p10 = pnand %p615_p8, %p611_p4 }
  0x28   : > { %619 = shalt.err (!%p616_p10)
}
  0x29   : > { %555 = dma.hbm_to_vmem [thread:$0]  (!%p854_p13), %s201_s12, 128, %s203_s11, %s865_s13  }
  0x2a   : > { %p232_p1 = scmp.lt.s32.totalorder %s765_s18, 3  ;;  %s179_s22 = scalar_lea.hbm %s983_s0, %s848_s29 }
  0x2b   : > { %s181_s20 = sshll.u32 %s179_s22, 4  ;;  %s175_s23 = scalar_lea.vmem [#allocation2], %s852_s30  ;;  %s182_s20 = int_to_ptr.hbm [resolvable:$true] %s181_s20 }
  0x2c   : > { %p888_p3 = pnand %p532_p0, %p232_p1  ;;  %s183_s7 = sshll.u32 %s175_s23, 4  ;;  %s184_s7 = int_to_ptr.vmem [resolvable:$true] %s183_s7 }
  0x2d   : > { %s172_s8 = scalar_lea.sflag [#allocation3], %s171_s28  ;;  %s635_s9 = sshra.s32 %s182_s20, 4  ;;  %s636_s9 = int_to_ptr.hbm [resolvable:$true] %s635_s9 }
  0x2e   : > { %s637_s11 = scalar_lea.hbm %s636_s9, 8  ;;  %s642_s10 = scalar_lea.hbm %s983_s0, 16 }
  0x2f   : > { %p638_p4 = scmp.ne.s32.totalorder %s636_s9, %s637_s11  ;;  %p643_p0 = scmp.lt.s32.totalorder %s636_s9, %s983_s0 }
  0x30   : > { %p644_p8 = scmp.lt.s32.totalorder %s642_s10, %s637_s11 }
  0x31   : > { %p640_p5 = pnand %p638_p4, %p609_p2 }
  0x32   : > { %p645_p10 = por %p644_p8, %p643_p0 }
  0x33   : > { %p641_p7 = pneg %p640_p5 }
  0x35   : > { %p646_p1 = pnand %p645_p10, %p641_p7 }
  0x37   : > { %649 = shalt.err (!%p646_p1)
}
  0x38   : > { %552 = dma.hbm_to_vmem [thread:$0]  (!%p854_p13), %s182_s20, 128, %s184_s7, %s172_s8  }
  0x39   : > { %s217_s24 = scalar_lea.hbm %s985_s2, %s848_s29  ;;  %s213_s12 = scalar_lea.vmem [#allocation7], %s852_s30 }
  0x3a   : > { %s221_s6 = sshll.u32 %s213_s12, 4  ;;  %s219_s17 = sshll.u32 %s217_s24, 4  ;;  %s222_s6 = int_to_ptr.vmem [resolvable:$true] %s221_s6  ;;  %s220_s17 = int_to_ptr.hbm [resolvable:$true] %s219_s17 }
  0x3b   : > { %s665_s1 = sshra.s32 %s220_s17, 4  ;;  %s672_s20 = scalar_lea.hbm %s985_s2, 16  ;;  %s666_s1 = int_to_ptr.hbm [resolvable:$true] %s665_s1 }
  0x3c   : > { %s667_s9 = scalar_lea.hbm %s666_s1, 8  ;;  %p673_p0 = scmp.lt.s32.totalorder %s666_s1, %s985_s2 }
  0x3d   : > { %p668_p4 = scmp.ne.s32.totalorder %s666_s1, %s667_s9  ;;  %p674_p8 = scmp.lt.s32.totalorder %s672_s20, %s667_s9 }
  0x3f   : > { %p670_p5 = pnand %p668_p4, %p609_p2  ;;  %p675_p10 = por %p674_p8, %p673_p0 }
  0x41   : > { %p671_p7 = pneg %p670_p5 }
  0x43   : > { %p676_p1 = pnand %p675_p10, %p671_p7 }
  0x45   : > { %679 = shalt.err (!%p676_p1)
}
  0x46   : > { %558 = dma.hbm_to_vmem [thread:$0]  (!%p854_p13), %s220_s17, 128, %s222_s6, %s865_s13  }
  0x47   : > { %236 = sbr.rel (%p888_p3) target bundleno = 152 (0x98), region = 36  ;;  %s926_s24 = sand.u32 (!%p888_p3), 1, %s757_s16  }
  0x48   : > { %s929_s29 = sshll.u32 (!%p888_p3), %s926_s24, 3  ;;  %s239_s30 = scalar_lea.sflag (!%p888_p3), [#allocation3], %s926_s24 }
  0x49   : > { %s242_s22 = scalar_lea.vmem (!%p888_p3), [#allocation2], %s929_s29 }
  0x4c   : > { %740 = dma.done.wait (%p831_p6), %s239_s30, 128  }
  0x4d   : > { %742 = vsyncadd (%p831_p6), %s239_s30, 4294967168  ;;  %s248_s17 = sand.u32 1, %s813_s19   ;;  %s252_s13 = scalar_lea.vmem [#allocation5], %s929_s29 }
  0x4e   : > { %s249_s5 = scalar_lea.sflag [#allocation6], %s248_s17 }
  0x4f   : > { %744 = dma.done.wait (%p831_p6), %s249_s5, 256  }
  0x50   : > { %746 = vsyncadd (%p831_p6), %s249_s5, 4294967040  ;;  %v304_v0 = vld [vmem:[%s242_s22] sm:$0xff]  ;;  %vm335_vm0 = vcmask 1045504   ;;  %v305_v15 = vld [vmem:[%s252_s13] sm:$0xff]  ;;  %s262_s25 = scalar_lea.vmem [#allocation7], %s929_s29  ;;  %p301_p6 = scmp.lt.s32.totalorder %s813_s19, 1  ;;  %v376_v58 = vlaneseq }
  0x51   : > { %v328_v1 = vrot.slane %v304_v0, 7  ;;  %v308_v8 = vsub.f32 0.0, %v304_v0  ;;  %v311_v17 = vmul.f32 %v305_v15, %v304_v0  ;;  %v306_v19 = vld [vmem:[%s262_s25] sm:$0xff]  ;;  %s536_s6 = sshll.u32 %s926_s24, 1  ;;  %s538_s1 = sshll.u32 %s813_s19, 1 }
  0x52   : > { %s302_s14 = scalar_select %p301_p6, %s813_s19, 1 }
  0x53   : > { %v330_v2 = vsub.f32 %v304_v0, %v328_v1  ;;  %v309_v11 = vmul.f32 1.442695, %v308_v8  ;;  %v312_v20 = vrot.slane %v311_v17, 4  ;;  %v377_v0 = vshrl.u32 %v376_v58, 7  ;;  %s396_s10 = scalar_lea.hbm %s987_s4, %s538_s1  ;;  %s300_s20 = scalar_lea.vmem [#allocation8], %s536_s6 }
  0x54   : > { %s303_s12 = scalar_lea.vmem %s986_s3, %s302_s14  ;;  %s398_s7 = sshll.u32 %s300_s20, 4  ;;  %s399_s7 = int_to_ptr.vmem [resolvable:$true] %s398_s7 }
  0x55   : > { %v331_v3 = vmul.f32 %v330_v2, %v330_v2  ;;  %597 = vpow2.f32 %v309_v11  ;;  %v313_v24 = vadd.f32 %v312_v20, %v311_v17  ;;  %v307_v34 = vld [vmem:[%s303_s12] sm:$0x1]  ;;  %s400_s8 = sshll.u32 %s396_s10, 4  ;;  %vm378_vm5 = vcmp.eq.s32.totalorder %v377_v0, 0  ;;  %s386_s19 = scalar_lea.sflag [#allocation4], %s926_s24  ;;  %s401_s8 = int_to_ptr.hbm [resolvable:$true] %s400_s8 }
  0x56   : > { %s709_s29 = sshra.s32 %s401_s8, 4  ;;  %s715_s5 = scalar_lea.hbm %s987_s4, 4  ;;  %s710_s29 = int_to_ptr.hbm [resolvable:$true] %s709_s29 }
  0x57   : > { %v333_v4 = vrot.slane %v331_v3, 1  ;;  %v314_v30 = vrot.slane %v313_v24, 2  ;;  %s711_s30 = scalar_lea.hbm %s710_s29, 2  ;;  %p716_p4 = scmp.lt.s32.totalorder %s710_s29, %s987_s4 }
  0x58   : > { %p712_p13 = scmp.ne.s32.totalorder %s710_s29, %s711_s30  ;;  %p717_p5 = scmp.lt.s32.totalorder %s715_s5, %s711_s30 }
  0x59   : > { %v336_v5 = vsel %vm335_vm0, %v333_v4, 0.0  ;;  %v315_v36 = vadd.f32 %v314_v30, %v313_v24 }
  0x5a   : > { %v337_v6 = vrot.slane %v336_v5, 4  ;;  %p713_p2 = pnand %p712_p13, %p838_p11  ;;  %p718_p7 = por %p717_p5, %p716_p4 }
  0x5b   : > { %v598_v18 = vpop.eup %597  ;;  %v316_v40 = vrot.slane %v315_v36, 1 }
  0x5c   : > { %v338_v7 = vadd.f32 %v337_v6, %v336_v5  ;;  %v319_v21 = vmul.f32 %v598_v18, %v306_v19  ;;  %p714_p3 = pneg %p713_p2 }
  0x5d   : > { %v317_v43 = vadd.f32 %v316_v40, %v315_v36 }
  0x5e   : > { %v339_v9 = vrot.slane %v338_v7, 2  ;;  %v320_v25 = vrot.slane %v319_v21, 4  ;;  %p719_p0 = pnand %p718_p7, %p714_p3 }
  0x5f   : > { %v318_v49 = vsub.f32 0.0, %v317_v43 }
  0x60   : > { %v340_v10 = vadd.f32 %v339_v9, %v338_v7  ;;  %v321_v31 = vadd.f32 %v320_v25, %v319_v21 }
  0x62   : > { %v341_v12 = vrot.slane %v340_v10, 1  ;;  %v322_v37 = vrot.slane %v321_v31, 2 }
  0x64   : > { %v342_v13 = vadd.f32 %v341_v12, %v340_v10  ;;  %v323_v41 = vadd.f32 %v322_v37, %v321_v31 }
  0x66   : > { %v343_v14 = vmul.f32 0.5, %v342_v13  ;;  %v324_v44 = vrot.slane %v323_v41, 1 }
  0x68   : > { %v344_v16 = vadd.f32 0.001, %v343_v14  ;;  %v325_v50 = vadd.f32 %v324_v44, %v323_v41 }
  0x6a   : > { %599 = vrcp.f32 %v344_v16  ;;  %v360_v26 = vand.u32 2147483648, %v344_v16  ;;  %vm354_vm1 = vweird.f32 %v344_v16  ;;  %v358_v28 = vand.u32 2147483647, %v344_v16 }
  0x6b   : > { %601 = vlog2.f32 %v344_v16  ;;  %v326_v59 = vsub.f32 %v318_v49, %v325_v50 }
  0x6c   : > { %v361_v32 = vor.u32 1.1754944e-38, %v360_v26  ;;  %vm359_vm4 = vcmp.eq.f32.partialorder %v358_v28, 8.507059e+37 }
  0x70   : > { %v600_v22 = vpop.eup %599 }
  0x71   : > { %v350_v23 = vmul.f32 %v600_v22, %v344_v16  ;;  %vm355_vm2 = vweird.f32 %v600_v22  ;;  %v602_v42 = vpop.eup %601 }
  0x72   : > { %vm356_vm3 = vmor %vm354_vm1, %vm355_vm2  ;;  %v346_v46 = vmul.f32 0.6931472, %v602_v42 }
  0x73   : > { %v351_v27 = vsub.f32 1.0, %v350_v23 }
  0x74   : > { %v347_v53 = vmul.f32 3.001, %v346_v46 }
  0x75   : > { %v352_v29 = vmul.f32 %v600_v22, %v351_v27 }
  0x76   : > { %v348_v61 = vsub.f32 -11.733647, %v347_v53 }
  0x77   : > { %v353_v33 = vadd.f32 %v600_v22, %v352_v29 }
  0x78   : > { %v379_v2 = vadd.f32 %v348_v61, %v326_v59 }
  0x79   : > { %v357_v35 = vsel %vm356_vm3, %v600_v22, %v353_v33 }
  0x7a   : > { %v362_v38 = vsel %vm359_vm4, %v361_v32, %v357_v35 }
  0x7b   : > { %v363_v39 = vmul.f32 %v362_v38, %v307_v34 }
  0x7d   : > { %603 = vlog2.f32 %v363_v39  ;;  %v369_v48 = vmul.f32 0.5, %v363_v39  ;;  %v374_v57 = vmul.f32 0.001, %v363_v39 }
  0x7f   : > { %v370_v55 = vmul.f32 %v369_v48, %v342_v13 }
  0x83   : > { %v604_v45 = vpop.eup %603 }
  0x84   : > { %v365_v47 = vmul.f32 0.6931472, %v604_v45 }
  0x86   : > { %v366_v51 = vmul.f32 0.5, %v365_v47  ;;  %v372_v52 = vmul.f32 -0.999, %v365_v47 }
  0x88   : > { %v367_v54 = vadd.f32 -0.9189385, %v366_v51  ;;  %v373_v56 = vadd.f32 -6.914087, %v372_v52 }
  0x8a   : > { %v368_v60 = vmul.f32 6.0, %v367_v54  ;;  %v375_v63 = vsub.f32 %v373_v56, %v374_v57 }
  0x8c   : > { %v371_v62 = vsub.f32 %v368_v60, %v370_v55 }
  0x8e   : > { %v380_v1 = vadd.f32 %v371_v62, %v326_v59 }
  0x90   : > { %v381_v3 = vadd.f32 %v380_v1, %v375_v63 }
  0x92   : > { %v382_v4 = vperm.slane %v381_v3, 0 }
  0x94   : > { %v383_v5 = vsel %vm378_vm5, %v379_v2, %v382_v4 }
  0x95   : > { %384 = vst [vmem:[%s300_s20] sm:$0x3] %v383_v5 }
  0x96   : > { %722 = shalt.err (!%p719_p0)
}
  0x97   : > { %547 = dma.vmem_to_hbm [thread:$0]  (%p838_p11), %s399_s7, 32, %s401_s8, %s386_s19  }
  0x98 PF: > { %s412_s24 = sand.u32 1, %s753_s15   ;;  %p560_p8 = pnand %p525_p9, %p842_p12 }
  0x99   : > { %s413_s14 = scalar_lea.sflag [#allocation4], %s412_s24 }
  0x9a   : > { %p561_p10 = pneg %p560_p8 }
  0x9c   : > { %748 = dma.done.wait (%p561_p10), %s413_s14, 32  }
  0x9d   : > { %750 = vsyncadd (%p561_p10), %s413_s14, 4294967264  ;;  %s998_s28 = sld [smem:[#allocation12_spill]]  ;;  %p20_p1 = scmp.ge.s32.totalorder %s817_s21, 4  }
  0x9e   : > { %s999_s17 = sld [smem:[#allocation13_spill]]  ;;  %s1000_s15 = smov %s757_s16 }
  0x9f   : > { %s1002_s18 = smov %s817_s21  ;;  %22 = sbr.rel (!%p20_p1) target bundleno = 9 (0x9), region = 108 }
  0xa3   : > { %s1001_s16 = smov %s998_s28 }
  0xa4   :  { %419 = vsyncpa [#allocation3], 1 }
  0xa5   :  { %421 = vsyncpa [#allocation3 + $0x1], 1 }
  0xa6   :  { %422 = vsyncpa [#allocation6], 1 }
  0xa7   :  { %424 = vsyncpa [#allocation6 + $0x1], 1 }
  0xa8   :  { %425 = vsyncpa [#allocation4], 1 }
  0xa9   :  { %427 = vsyncpa [#allocation4 + $0x1], 1 }

</bundles_post_ra>
